<compile_context>
chip_gen: v6e
topology: v6e:2x2x1
jax: 0.10.0
libtpu: 0.0.40
codegen_flags: <defaults>
</compile_context>

<pallas_src>
import functools

import jax
import jax.numpy as jnp
from jax.experimental import pallas as pl
from jax.experimental.pallas import tpu as pltpu

EPS = 1e-6  # matches torch.nn.functional.pairwise_distance default eps


def _contrastive_partial_kernel(x1_ref, x2_ref, label_ref, out_ref, *,
                                margin, total_b, tile_b):
    pid = pl.program_id(0)

    x1 = x1_ref[...].astype(jnp.float32)        # (TB, D)
    x2 = x2_ref[...].astype(jnp.float32)        # (TB, D)
    label = label_ref[...].astype(jnp.float32)  # (TB, 1)

    # pairwise_distance: ||x1 - x2 + eps||_2 along the feature dim.
    diff = x1 - x2 + EPS
    d2 = jnp.sum(diff * diff, axis=-1, keepdims=True)      # (TB, 1)  XLU reduce
    d = jnp.sqrt(d2)                                        # (TB, 1)
    hinge = jnp.maximum(margin - d, 0.0)
    # Positive term uses d2 directly; only the hinge needs the sqrt.
    per_pair = (1.0 - label) * d2 + label * (hinge * hinge)  # (TB, 1)

    # Mask rows past the true batch size (last tile may be partial).
    # Keep this a select (jnp.where), never arithmetic masking.
    row = pid * tile_b + jax.lax.broadcasted_iota(jnp.int32, (tile_b, 1), 0)
    per_pair = jnp.where(row < total_b, per_pair, 0.0)

    # Per-block partial sum into an SMEM scalar block; final /B in the wrapper.
    out_ref[0, 0] = jnp.sum(per_pair)


def _choose_tile_b(B, D, in_dtype, max_tile_b=None, target_step_bytes=4 << 20):
    """Pick TB so each grid step streams ~target_step_bytes of input
    (two (TB, D) tiles).  ~4 MiB/step amortizes the ~0.35 us fixed per-step
    overhead on every generation (incl. v7x at ~3.2 TB/s) while keeping the
    double-buffered footprint small."""
    itemsize = jnp.dtype(in_dtype).itemsize
    per_row_bytes = 2 * D * itemsize            # one row from each input
    tb = max(8, target_step_bytes // per_row_bytes)
    tb = min(tb, 8192)                          # keep sublane extent sane
    if max_tile_b is not None:
        tb = min(tb, max_tile_b)
    if tb >= B:
        return B                                # single full-extent block (always legal)
    # Align the sublane tile to the packed-dtype tile (f32: 8, bf16: 16, int8: 32).
    align = max(8, 32 // itemsize)
    return max(align, (tb // align) * align)


def _vmem_limit_bytes(tb, D, in_dtype):
    """Scoped-VMEM request: 2 inputs x 2 pipeline buffers + f32 upcast /
    diff / sq intermediates + lane-padded (TB,1)->(TB,128) temporaries."""
    itemsize = jnp.dtype(in_dtype).itemsize
    inputs = 2 * 2 * tb * D * itemsize          # x1, x2, double-buffered
    interm = 3 * tb * D * 4                     # f32 upcasts / diff / sq (fused, conservative)
    label = 2 * tb * 128 * 4                    # (TB,1) label blocks lane-pad to (TB,128)
    temps = 4 * tb * 128 * 4                    # d2, d, hinge, per_pair lane-padded
    est = inputs + interm + label + temps + (2 << 20)
    # Floor at the common default (safe on all generations); cap below v7x's
    # 64 MiB physical VMEM.
    return int(min(48 << 20, max(32 << 20, est)))


def contrastive_loss(output1, output2, label, margin=2.0, max_tile_b=None):
    """output1, output2: (B, D) float (f32 or bf16); label: (B,) or (B, 1).
    Returns scalar f32 loss."""
    B, D = output1.shape
    label2d = jnp.reshape(label, (B, 1)).astype(jnp.float32)

    tb = _choose_tile_b(B, D, output1.dtype, max_tile_b)
    num_blocks = pl.cdiv(B, tb)

    kernel = functools.partial(
        _contrastive_partial_kernel,
        margin=float(margin), total_b=B, tile_b=tb,
    )

    partials = pl.pallas_call(
        kernel,
        out_shape=jax.ShapeDtypeStruct((num_blocks, 1), jnp.float32),
        grid=(num_blocks,),
        in_specs=[
            pl.BlockSpec((tb, D), lambda i: (i, 0)),
            pl.BlockSpec((tb, D), lambda i: (i, 0)),
            pl.BlockSpec((tb, 1), lambda i: (i, 0)),
        ],
        # Per-step scalar partial goes to SMEM: no sub-(8,128) VMEM block and
        # no masked-vst / per-step HBM writeback DMA on the vector path.
        out_specs=pl.BlockSpec((1, 1), lambda i: (i, 0),
                               memory_space=pltpu.SMEM),
        compiler_params=pltpu.CompilerParams(
            dimension_semantics=("parallel",),   # shards across TCs on v7x
            vmem_limit_bytes=_vmem_limit_bytes(tb, D, output1.dtype),
        ),
    )(output1, output2, label2d)

    return jnp.sum(partials) / jnp.float32(B)


def _reference_loss(output1, output2, label, margin=2.0):
    # Pure-JAX reference mirroring the PyTorch forward.
    d = jnp.sqrt(jnp.sum((output1.astype(jnp.float32)
                          - output2.astype(jnp.float32) + EPS) ** 2, axis=-1))
    label = label.astype(jnp.float32).reshape(-1)
    return jnp.mean((1.0 - label) * d ** 2
                    + label * jnp.maximum(margin - d, 0.0) ** 2)


if __name__ == "__main__":
    key = jax.random.PRNGKey(0)

    configs = [
        # (B, D, max_tile_b, dtype) -- small shapes; the middle two force batch
        # tiling with a partial (masked) final tile; the last exercises bf16
        # inputs (halved HBM traffic) with f32 math inside the kernel.
        (8, 128, None, jnp.float32),
        (20, 128, 8, jnp.float32),
        (16, 512, 8, jnp.float32),
        (24, 256, None, jnp.bfloat16),
    ]

    ok = True
    for idx, (B, D, max_tb, dt) in enumerate(configs):
        k1, k2, k3 = jax.random.split(jax.random.fold_in(key, idx), 3)
        output1 = jax.random.normal(k1, (B, D), dtype=jnp.float32).astype(dt)
        output2 = jax.random.normal(k2, (B, D), dtype=jnp.float32).astype(dt)
        label = jax.random.bernoulli(k3, 0.5, (B,)).astype(jnp.float32)

        loss = contrastive_loss(output1, output2, label, margin=2.0,
                                max_tile_b=max_tb)
        loss = jax.block_until_ready(loss)

        ref = _reference_loss(output1, output2, label, margin=2.0)
        if not jnp.allclose(loss, ref, rtol=1e-5, atol=1e-5):
            ok = False
            print(f"MISMATCH config={idx} kernel={loss} ref={ref}")

    if ok:
        print("KERNEL_OK")
</pallas_src>

<mosaic_0001>
module attributes {stable_mosaic.version = 11 : i64} {
  func.func @_contrastive_partial_kernel(%arg0: i32, %arg1: memref<8x128xf32, #tpu.memory_space<vmem>>, %arg2: memref<8x128xf32, #tpu.memory_space<vmem>>, %arg3: memref<8x1xf32, #tpu.memory_space<vmem>>, %arg4: memref<1x1xf32, #tpu.memory_space<smem>>) attributes {dimension_semantics = [#tpu.dimension_semantics<parallel>], iteration_bounds = array<i64: 1>, scalar_prefetch = 0 : i64, scratch_operands = 0 : i64, tpu.core_type = #tpu.core_type<tc>, window_params = [{transform_indices = @transform_0, window_bounds = array<i64: 8, 128>}, {transform_indices = @transform_1, window_bounds = array<i64: 8, 128>}, {transform_indices = @transform_2, window_bounds = array<i64: 8, 1>}, {transform_indices = @transform_3, window_bounds = array<i64: 1, 1>}]} {
    %c0 = arith.constant 0 : index
    %c0_0 = arith.constant 0 : index
    %0 = vector.load %arg1[%c0, %c0_0] : memref<8x128xf32, #tpu.memory_space<vmem>>, vector<8x128xf32>
    %c0_1 = arith.constant 0 : index
    %c0_2 = arith.constant 0 : index
    %1 = vector.load %arg2[%c0_1, %c0_2] : memref<8x128xf32, #tpu.memory_space<vmem>>, vector<8x128xf32>
    %c0_3 = arith.constant 0 : index
    %c0_4 = arith.constant 0 : index
    %2 = vector.load %arg3[%c0_3, %c0_4] : memref<8x1xf32, #tpu.memory_space<vmem>>, vector<8x1xf32>
    %3 = arith.subf %0, %1 : vector<8x128xf32>
    %cst = arith.constant 9.99999997E-7 : f32
    %4 = vector.broadcast %cst : f32 to vector<8x128xf32>
    %5 = arith.addf %3, %4 : vector<8x128xf32>
    %6 = arith.mulf %5, %5 : vector<8x128xf32>
    %cst_5 = arith.constant dense<0.000000e+00> : vector<8xf32>
    %7 = vector.multi_reduction <add>, %6, %cst_5 [1] : vector<8x128xf32> to vector<8xf32>
    %8 = vector.shape_cast %7 : vector<8xf32> to vector<8x1xf32>
    %9 = math.sqrt %8 : vector<8x1xf32>
    %cst_6 = arith.constant 2.000000e+00 : f32
    %10 = vector.broadcast %cst_6 : f32 to vector<8x1xf32>
    %11 = arith.subf %10, %9 : vector<8x1xf32>
    %cst_7 = arith.constant 0.000000e+00 : f32
    %12 = vector.broadcast %cst_7 : f32 to vector<8x1xf32>
    %13 = arith.maximumf %11, %12 : vector<8x1xf32>
    %cst_8 = arith.constant 1.000000e+00 : f32
    %14 = vector.broadcast %cst_8 : f32 to vector<8x1xf32>
    %15 = arith.subf %14, %2 : vector<8x1xf32>
    %16 = arith.mulf %15, %8 : vector<8x1xf32>
    %17 = arith.mulf %13, %13 : vector<8x1xf32>
    %18 = arith.mulf %2, %17 : vector<8x1xf32>
    %19 = arith.addf %16, %18 : vector<8x1xf32>
    %c8_i32 = arith.constant 8 : i32
    %20 = arith.muli %arg0, %c8_i32 : i32
    %21 = tpu.iota {dimensions = array<i32: 0>} : vector<8x1xi32>
    %22 = vector.broadcast %20 : i32 to vector<8x1xi32>
    %23 = arith.addi %22, %21 : vector<8x1xi32>
    %c8_i32_9 = arith.constant 8 : i32
    %24 = vector.broadcast %c8_i32_9 : i32 to vector<8x1xi32>
    %25 = arith.cmpi slt, %23, %24 : vector<8x1xi32>
    %cst_10 = arith.constant 0.000000e+00 : f32
    %26 = vector.broadcast %cst_10 : f32 to vector<8x1xf32>
    %27 = arith.select %25, %19, %26 : vector<8x1xi1>, vector<8x1xf32>
    %28 = vector.shape_cast %27 : vector<8x1xf32> to vector<1x8x1xf32>
    %cst_11 = arith.constant dense<0.000000e+00> : vector<1xf32>
    %29 = vector.multi_reduction <add>, %28, %cst_11 [1, 2] : vector<1x8x1xf32> to vector<1xf32>
    %30 = vector.shape_cast %29 : vector<1xf32> to vector<1x1x1xf32>
    %31 = vector.extract %30[0, 0, 0] : f32 from vector<1x1x1xf32>
    %c0_12 = arith.constant 0 : index
    %c0_13 = arith.constant 0 : index
    %32 = memref.load %arg4[%c0_12, %c0_13] : memref<1x1xf32, #tpu.memory_space<smem>>
    memref.store %31, %arg4[%c0_12, %c0_13] : memref<1x1xf32, #tpu.memory_space<smem>>
    return
  }
  func.func @transform_0(%arg0: i32) -> (i32, i32) {
    %c0_i32 = arith.constant 0 : i32
    %c0_i32_0 = arith.constant 0 : i32
    return %arg0, %c0_i32 : i32, i32
  }
  func.func @transform_1(%arg0: i32) -> (i32, i32) {
    %c0_i32 = arith.constant 0 : i32
    %c0_i32_0 = arith.constant 0 : i32
    return %arg0, %c0_i32 : i32, i32
  }
  func.func @transform_2(%arg0: i32) -> (i32, i32) {
    %c0_i32 = arith.constant 0 : i32
    %c0_i32_0 = arith.constant 0 : i32
    return %arg0, %c0_i32 : i32, i32
  }
  func.func @transform_3(%arg0: i32) -> (i32, i32) {
    %c0_i32 = arith.constant 0 : i32
    %c0_i32_0 = arith.constant 0 : i32
    return %arg0, %c0_i32 : i32, i32
  }
}

</mosaic_0001>

<bundles_post_ra>
// kernel: tpu_custom_call.1
= control target key start
LH: loop header
LB: loop body
LE: loop exit
PB: predicated region body
PF: predicated region fallthrough
CT: control target
= control target key end

     0   :  { %8 = vsyncpa [#allocation3], 0  ;;  %s155_s0 = inlined_call_operand.vmem [shape: f32[8,128], index: 0, kind: input, shape index: {}]   ;;  %s156_s1 = inlined_call_operand.hbm [shape: f32[8,128], index: 1, kind: input, shape index: {}]   ;;  %s157_s2 = inlined_call_operand.vmem [shape: f32[8,1], index: 2, kind: input, shape index: {}]   ;;  %s158_s3 = inlined_call_operand.hbm [shape: f32[1,1], index: 3, kind: output, shape index: {}]  }
   0x1   :  { %9 = vsyncpa [#allocation4], 0  ;;  %s121_s12 = smov [#allocation2]  }
   0x2   :  { %s18_s13 = sshll.u32 %s121_s12, 4  ;;  %s19_s13 = int_to_ptr.vmem [resolvable:$true] %s18_s13 }
   0x3   :  { %s97_s14 = scalar_lea.vmem %s19_s13, 128  ;;  %p102_p1 = scmp.lt.s32.totalorder %s19_s13, %s19_s13 }
   0x4   :  { %p98_p0 = scmp.ne.s32.totalorder %s19_s13, %s97_s14  ;;  %p103_p2 = scmp.lt.s32.totalorder %s97_s14, %s97_s14 }
   0x6   :  { %p104_p3 = por %p103_p2, %p102_p1 }
   0x8   :  { %p105_p4 = pnand %p104_p3, %p98_p0 }
   0xa   :  { %108 = shalt.err (!%p105_p4)
}
   0xb   :  { %21 = dma.hbm_to_vmem [thread:$0]  %s156_s1, 128, %s19_s13, [#allocation3]  }
   0xc   :  { %117 = dma.done.wait [#allocation3], 128  }
   0xd   :  { %118 = vsyncadd [#allocation3], 4294967168  ;;  %v27_v0 = vld [vmem:[%s155_s0] sm:$0xff]  ;;  %vm56_vm2 = vcmask 7168  }
   0xe   :  { %v28_v1 = vld [vmem:[#allocation2] sm:$0xff] }
   0xf   :  { %v30_v2 = vsub.f32 %v27_v0, %v28_v1  ;;  %v29_v10 = vld [vmem:[%s157_s2] sm:$0xff]  ;;  %s122_s2 = smov [#allocation5]  }
  0x10   :  { %v44_v14 = vsub.f32 1.0, %v29_v10 }
  0x11   :  { %v31_v3 = vadd.f32 1e-06, %v30_v2 }
  0x13   :  { %v32_v4 = vmul.f32 %v31_v3, %v31_v3 }
  0x15   :  { %33 = vadd.xlane.f32.xlu0 %v32_v4 }
  0x9e   :  { %v34_v5 = vpop.xlane.xlu0 %33 }
  0x9f   :  { %87 = vrsqrt.f32 %v34_v5  ;;  %vm37_vm0 = vcmp.eq.f32.partialorder %v34_v5, inf  ;;  %v40_v8 = vand.u32 2147483648, %v34_v5  ;;  %vm39_vm1 = vcmp.eq.f32.partialorder %v34_v5, 0.0 }
  0xa0   :  { %v45_v16 = vmul.f32 %v44_v14, %v34_v5 }
  0xac   :  { %v88_v6 = vpop.eup %87 }
  0xad   :  { %v36_v7 = vmul.f32 %v88_v6, %v34_v5 }
  0xaf   :  { %v38_v9 = vsel %vm37_vm0, %v34_v5, %v36_v7 }
  0xb0   :  { %v41_v11 = vsel %vm39_vm1, %v40_v8, %v38_v9 }
  0xb1   :  { %v42_v12 = vsub.f32 2.0, %v41_v11 }
  0xb3   :  { %v43_v13 = vmax.f32 %v42_v12, 0.0 }
  0xb5   :  { %v46_v15 = vmul.f32 %v43_v13, %v43_v13 }
  0xb7   :  { %v47_v17 = vmul.f32 %v46_v15, %v29_v10 }
  0xb9   :  { %v48_v18 = vadd.f32 %v47_v17, %v45_v16 }
  0xbb   :  { %v57_v19 = vsel %vm56_vm2, %v48_v18, 0.0 }
  0xbc   :  { %58 = vadd.xlane.f32.xlu0 %v57_v19 }
 0x145   :  { %v59_v20 = vpop.xlane.xlu0 %58 }
 0x146   :  { %v60_v21 = vrot.slane %v59_v20, 4 }
 0x148   :  { %v61_v22 = vadd.f32 %v60_v21, %v59_v20 }
 0x14a   :  { %v62_v23 = vrot.slane %v61_v22, 2 }
 0x14c   :  { %v63_v24 = vadd.f32 %v62_v23, %v61_v22 }
 0x14e   :  { %v64_v25 = vrot.slane %v63_v24, 1 }
 0x150   :  { %v65_v26 = vadd.f32 %v64_v25, %v63_v24 }
 0x152   :  { %83 = vpush %v65_v26 }
 0x183   :  { %s84_s0 = spop %83 }
 0x184   :  { %68 = sst [smem:[#allocation5]] %s84_s0 }
 0x185   :  { %76 = dma.smem_to_hbm %s122_s2, 16, %s158_s3, [#allocation4]  }
 0x186   :  { %119 = dma.done.wait [#allocation4], 16  }
 0x187   :  { %120 = vsyncadd [#allocation4], 4294967280 }
 0x188   :  { %80 = sfence }
 0x189   :  { %81 = vsyncpa [#allocation3], 1 }
 0x18a   :  { %82 = vsyncpa [#allocation4], 1 }

</bundles_post_ra>
